<compile_context>
chip_gen: v7x
topology: tpu7x:2x2x1
jax: 0.10.0
libtpu: 0.0.40
codegen_flags: <defaults>
</compile_context>

<pallas_src>
import functools

import jax
import jax.numpy as jnp
from jax import lax
from jax.experimental import pallas as pl
from jax.experimental.pallas import tpu as pltpu

_LANE = 128
_MAX_TILE_ROWS = 8192                    # 8192 x 128 x 4 B = 4 MiB per f32 block
_VMEM_LIMIT_BYTES = 32 * 1024 * 1024     # 2 inputs x 2 bufs x 4 MiB + headroom


def _l1_sum_kernel(x_ref, y_ref, o_ref, *, tile_rows, tiles_per_split,
                   valid_rows, mask_tail):
    """Accumulates per-lane partial sums of |x - y| into a resident (8,128) block."""
    s = pl.program_id(0)   # parallel split (dual-TC streaming on v7x)
    i = pl.program_id(1)   # sequential reduction over row tiles

    @pl.when(i == 0)
    def _init():
        o_ref[...] = jnp.zeros_like(o_ref)

    diff = jnp.abs(x_ref[...].astype(jnp.float32) - y_ref[...].astype(jnp.float32))

    if mask_tail:
        # Zero rows past the array end: covers both the ragged final real tile
        # and any phantom (clamped/duplicated) tile from the odd-count split.
        tile_idx = s * tiles_per_split + i
        row = tile_idx * tile_rows + lax.broadcasted_iota(jnp.int32, diff.shape, 0)
        diff = jnp.where(row < valid_rows, diff, 0.0)

    if tile_rows % 8 == 0:
        # Full-vreg accumulation: whole (8,128) vreg groups -> pure VALU adds
        # and one unmasked (8,128) store per step.
        o_ref[...] += jnp.sum(diff.reshape(tile_rows // 8, 8, _LANE), axis=0)
    else:
        # Fallback (single ragged block only): sublane reduce into the first row.
        o_ref[0:1, :] += jnp.sum(diff, axis=0, keepdims=True)


def _l1_sum_pallas(x2, y2, rows):
    """Sum of |x2 - y2| over a lane-dense (rows, 128) slab, via Pallas streaming."""
    if rows <= _MAX_TILE_ROWS:
        tile_rows = rows            # single block == full array extent (always legal)
        num_tiles = 1
    else:
        tile_rows = _MAX_TILE_ROWS  # multiple of 8; big streaming block
        num_tiles = pl.cdiv(rows, tile_rows)

    # 2-way split across the leading "parallel" axis whenever there are >=2 tiles
    # (odd counts included): phantom tiles are clamped to the last real tile and
    # masked to zero inside the kernel.
    nsplit = 2 if num_tiles >= 2 else 1
    tiles_per_split = pl.cdiv(num_tiles, nsplit)
    has_phantom = (nsplit * tiles_per_split) != num_tiles
    mask_tail = ((rows % tile_rows) != 0) or has_phantom
    last_tile = num_tiles - 1

    def in_map(s, i):
        t = s * tiles_per_split + i
        return (jnp.minimum(t, last_tile), 0)

    kernel = functools.partial(
        _l1_sum_kernel,
        tile_rows=tile_rows,
        tiles_per_split=tiles_per_split,
        valid_rows=rows,
        mask_tail=mask_tail,
    )

    itemsize = jnp.dtype(x2.dtype).itemsize
    cost = pl.CostEstimate(
        flops=3 * rows * _LANE,                                   # sub, abs, add
        transcendentals=0,
        bytes_accessed=2 * rows * _LANE * itemsize + nsplit * 8 * _LANE * 4,
    )

    partials = pl.pallas_call(
        kernel,
        out_shape=jax.ShapeDtypeStruct((nsplit * 8, _LANE), jnp.float32),
        grid_spec=pltpu.PrefetchScalarGridSpec(
            num_scalar_prefetch=0,
            grid=(nsplit, tiles_per_split),
            in_specs=[
                pl.BlockSpec((tile_rows, _LANE), in_map),
                pl.BlockSpec((tile_rows, _LANE), in_map),
            ],
            out_specs=pl.BlockSpec((8, _LANE), lambda s, i: (s, 0)),
        ),
        compiler_params=pltpu.CompilerParams(
            dimension_semantics=("parallel", "arbitrary"),
            vmem_limit_bytes=_VMEM_LIMIT_BYTES,
        ),
        cost_estimate=cost,
    )(x2, y2)

    # Deferred cross-lane reduce on the tiny (nsplit*8, 128) partial slab.
    return jnp.sum(partials)


def _l1_loss_mean_pallas(outputs, targets):
    n = outputs.size
    x = outputs.reshape(-1)   # contiguous row-major -> free bitcast reshape
    y = targets.reshape(-1)

    rows = n // _LANE
    main = rows * _LANE

    # Ragged <128-element tail: reduce it in plain JAX (no whole-array pad copy).
    tail_sum = jnp.float32(0.0)
    if main < n:
        tail_sum = jnp.sum(jnp.abs(x[main:].astype(jnp.float32) -
                                   y[main:].astype(jnp.float32)))

    if rows == 0:
        total = tail_sum
    else:
        if main < n:
            x_main, y_main = x[:main], y[:main]
        else:
            x_main, y_main = x, y
        x2 = x_main.reshape(rows, _LANE)
        y2 = y_main.reshape(rows, _LANE)
        total = _l1_sum_pallas(x2, y2, rows) + tail_sum

    # Note: f32 divide; exact enough for a loss (n > 2^24 loses a few ulps).
    return total / jnp.float32(n)


def l1_loss_mean(outputs, targets, *, min_pallas_elems=64 * 1024):
    """nn.L1Loss(reduction='mean')(outputs, targets) — Pallas-backed for large inputs."""
    assert outputs.shape == targets.shape, "outputs/targets must match shapes"
    n = outputs.size
    if n == 0 or n < min_pallas_elems:
        # Tiny inputs: a fused XLA reduction beats kernel-launch overhead.
        return jnp.mean(jnp.abs(outputs.astype(jnp.float32) -
                                targets.astype(jnp.float32)))
    return _l1_loss_mean_pallas(outputs, targets)


if __name__ == "__main__":
    key = jax.random.PRNGKey(0)
    k1, k2, k3, k4, k5, k6 = jax.random.split(key, 6)

    # 1) Small NCHW pair consistent with the module's forward (single block,
    #    rows % 8 == 0 -> full-vreg accumulation path).  Force the Pallas path.
    outputs = jax.random.normal(k1, (2, 4, 16, 16), dtype=jnp.float32)
    targets = jax.random.normal(k2, (2, 4, 16, 16), dtype=jnp.float32)
    loss = jax.block_until_ready(l1_loss_mean(outputs, targets, min_pallas_elems=0))
    ref = jnp.mean(jnp.abs(outputs - targets))
    assert jnp.allclose(loss, ref, rtol=1e-5, atol=1e-5), (loss, ref)

    # 2) Multi-tile case: 16484 rows -> 3 tiles of 8192, odd tile count
    #    (exercises the generalized 2-way split with a clamped phantom tile)
    #    plus a ragged final real tile (masked in-kernel).
    o2 = jax.random.normal(k3, (2, 8242, 128), dtype=jnp.float32)
    t2 = jax.random.normal(k4, (2, 8242, 128), dtype=jnp.float32)
    loss2 = jax.block_until_ready(l1_loss_mean(o2, t2))
    ref2 = jnp.mean(jnp.abs(o2 - t2))
    assert jnp.allclose(loss2, ref2, rtol=1e-5, atol=1e-5), (loss2, ref2)

    # 3) Ragged element count (n % 128 != 0): tail handled in plain JAX, no pad;
    #    single block with rows % 8 != 0 -> fallback sublane-reduce path.
    o3 = jax.random.normal(k5, (3, 5, 7, 11), dtype=jnp.float32)
    t3 = jax.random.normal(k6, (3, 5, 7, 11), dtype=jnp.float32)
    loss3 = jax.block_until_ready(l1_loss_mean(o3, t3, min_pallas_elems=0))
    ref3 = jnp.mean(jnp.abs(o3 - t3))
    assert jnp.allclose(loss3, ref3, rtol=1e-5, atol=1e-5), (loss3, ref3)

    print("KERNEL_OK")
</pallas_src>

<mosaic_0001>
module attributes {stable_mosaic.version = 11 : i64} {
  func.func @_l1_sum_kernel(%arg0: i32, %arg1: i32, %arg2: memref<16x128xf32, #tpu.memory_space<vmem>>, %arg3: memref<16x128xf32, #tpu.memory_space<vmem>>, %arg4: memref<8x128xf32, #tpu.memory_space<vmem>>) attributes {dimension_semantics = [#tpu.dimension_semantics<parallel>, #tpu.dimension_semantics<arbitrary>], iteration_bounds = array<i64: 1, 1>, scalar_prefetch = 0 : i64, scratch_operands = 0 : i64, tpu.core_type = #tpu.core_type<tc>, window_params = [{transform_indices = @transform_0, window_bounds = array<i64: 16, 128>}, {transform_indices = @transform_1, window_bounds = array<i64: 16, 128>}, {transform_indices = @transform_2, window_bounds = array<i64: 8, 128>}]} {
    %c0_i32 = arith.constant 0 : i32
    %0 = arith.cmpi eq, %arg1, %c0_i32 : i32
    %1 = arith.extui %0 : i1 to i32
    %c0_i32_0 = arith.constant 0 : i32
    %2 = arith.cmpi ne, %1, %c0_i32_0 : i32
    scf.if %2 {
      %cst_8 = arith.constant 0.000000e+00 : f32
      %12 = vector.broadcast %cst_8 : f32 to vector<8x128xf32>
      %c0_9 = arith.constant 0 : index
      %c0_10 = arith.constant 0 : index
      %13 = vector.load %arg4[%c0_9, %c0_10] : memref<8x128xf32, #tpu.memory_space<vmem>>, vector<8x128xf32>
      tpu.vector_store %arg4[%c0_9, %c0_10], %12 {strides = array<i32>} : memref<8x128xf32, #tpu.memory_space<vmem>>, vector<8x128xf32>,
    } else {
    }
    %c0 = arith.constant 0 : index
    %c0_1 = arith.constant 0 : index
    %3 = vector.load %arg2[%c0, %c0_1] : memref<16x128xf32, #tpu.memory_space<vmem>>, vector<16x128xf32>
    %c0_2 = arith.constant 0 : index
    %c0_3 = arith.constant 0 : index
    %4 = vector.load %arg3[%c0_2, %c0_3] : memref<16x128xf32, #tpu.memory_space<vmem>>, vector<16x128xf32>
    %5 = arith.subf %3, %4 : vector<16x128xf32>
    %6 = math.absf %5 : vector<16x128xf32>
    %c0_4 = arith.constant 0 : index
    %c0_5 = arith.constant 0 : index
    %7 = vector.load %arg4[%c0_4, %c0_5] : memref<8x128xf32, #tpu.memory_space<vmem>>, vector<8x128xf32>
    %8 = vector.shape_cast %6 : vector<16x128xf32> to vector<2x8x128xf32>
    %cst = arith.constant dense<0.000000e+00> : vector<8x128xf32>
    %9 = vector.multi_reduction <add>, %8, %cst [0] : vector<2x8x128xf32> to vector<8x128xf32>
    %10 = arith.addf %7, %9 : vector<8x128xf32>
    %c0_6 = arith.constant 0 : index
    %c0_7 = arith.constant 0 : index
    %11 = vector.load %arg4[%c0_6, %c0_7] : memref<8x128xf32, #tpu.memory_space<vmem>>, vector<8x128xf32>
    tpu.vector_store %arg4[%c0_6, %c0_7], %10 {strides = array<i32>} : memref<8x128xf32, #tpu.memory_space<vmem>>, vector<8x128xf32>,
    return
  }
  func.func @transform_0(%arg0: i32, %arg1: i32) -> (i32, i32) {
    %c1_i32 = arith.constant 1 : i32
    %0 = arith.muli %arg0, %c1_i32 : i32
    %1 = arith.addi %0, %arg1 : i32
    %c0_i32 = arith.constant 0 : i32
    %2 = arith.minsi %1, %c0_i32 : i32
    %c0_i32_0 = arith.constant 0 : i32
    %c0_i32_1 = arith.constant 0 : i32
    return %2, %c0_i32_0 : i32, i32
  }
  func.func @transform_1(%arg0: i32, %arg1: i32) -> (i32, i32) {
    %c1_i32 = arith.constant 1 : i32
    %0 = arith.muli %arg0, %c1_i32 : i32
    %1 = arith.addi %0, %arg1 : i32
    %c0_i32 = arith.constant 0 : i32
    %2 = arith.minsi %1, %c0_i32 : i32
    %c0_i32_0 = arith.constant 0 : i32
    %c0_i32_1 = arith.constant 0 : i32
    return %2, %c0_i32_0 : i32, i32
  }
  func.func @transform_2(%arg0: i32, %arg1: i32) -> (i32, i32) {
    %c0_i32 = arith.constant 0 : i32
    %c0_i32_0 = arith.constant 0 : i32
    return %arg0, %c0_i32 : i32, i32
  }
}

</mosaic_0001>

<bundles_post_ra>
// kernel: tpu_custom_call.1
= control target key start
LH: loop header
LB: loop body
LE: loop exit
PB: predicated region body
PF: predicated region fallthrough
CT: control target
= control target key end

     0   :  { %7 = vsyncpa [#allocation3], 0  ;;  %s231_s0 = inlined_call_operand.hbm [shape: f32[16,128], index: 0, kind: input, shape index: {}]   ;;  %s232_s1 = inlined_call_operand.hbm [shape: f32[16,128], index: 1, kind: input, shape index: {}]   ;;  %s233_s2 = inlined_call_operand.hbm [shape: f32[8,128], index: 2, kind: output, shape index: {}]  }
   0x1   :  { %8 = vsyncpa [#allocation6], 0 }
   0x2   :  { %9 = vsyncpa [#allocation4], 0  ;;  %s175_s9 = smov [#allocation2]   ;;  %s103_s13 = scalar_lea.hbm %s231_s0, 256 }
   0x3   :  { %s21_s10 = sshll.u32 %s175_s9, 4  ;;  %p104_p0 = scmp.ne.s32.totalorder %s231_s0, %s103_s13  ;;  %s22_s10 = int_to_ptr.vmem [resolvable:$true] %s21_s10 }
   0x4   :  { %p107_p1 = scmp.lt.u32.totalorder %s103_s13, %s231_s0 }
   0x6   :  { %p109_p2 = pnand %p107_p1, %p104_p0 }
   0x8   :  { %112 = shalt.err (!%p109_p2)
}
   0x9   :  { %s113_s18 = scalar_lea.vmem %s22_s10, 256  ;;  %p118_p4 = scmp.lt.s32.totalorder %s22_s10, %s22_s10 }
   0xa   :  { %p114_p3 = scmp.ne.s32.totalorder %s22_s10, %s113_s18  ;;  %p119_p5 = scmp.lt.s32.totalorder %s113_s18, %s113_s18 }
   0xc   :  { %p120_p6 = por %p119_p5, %p118_p4 }
   0xe   :  { %p121_p7 = pnand %p120_p6, %p114_p3 }
  0x10   :  { %124 = shalt.err (!%p121_p7)
}
  0x11   :  { %s176_s19 = smov 128   ;;  %s177_s20 = smov 8  }
  0x12   :  { %27 = dma.hbm_to_vmem [thread:$0]  %s231_s0, 256, %s22_s10, [#allocation3], %s176_s19, %s176_s19, %s177_s20  }
  0x13   :  { %s178_s23 = smov [#allocation5]   ;;  %s125_s27 = scalar_lea.hbm %s232_s1, 256 }
  0x14   :  { %s39_s24 = sshll.u32 %s178_s23, 4  ;;  %p126_p8 = scmp.ne.s32.totalorder %s232_s1, %s125_s27  ;;  %s40_s24 = int_to_ptr.vmem [resolvable:$true] %s39_s24 }
  0x15   :  { %p129_p9 = scmp.lt.u32.totalorder %s125_s27, %s232_s1 }
  0x17   :  { %p131_p10 = pnand %p129_p9, %p126_p8 }
  0x19   :  { %134 = shalt.err (!%p131_p10)
}
  0x1a   :  { %s135_s4 = scalar_lea.vmem %s40_s24, 256  ;;  %p140_p12 = scmp.lt.s32.totalorder %s40_s24, %s40_s24 }
  0x1b   :  { %p136_p11 = scmp.ne.s32.totalorder %s40_s24, %s135_s4  ;;  %p141_p13 = scmp.lt.s32.totalorder %s135_s4, %s135_s4 }
  0x1d   :  { %p142_p0 = por %p141_p13, %p140_p12 }
  0x1f   :  { %p143_p1 = pnand %p142_p0, %p136_p11 }
  0x21   :  { %146 = shalt.err (!%p143_p1)
}
  0x22   :  { %45 = dma.hbm_to_vmem [thread:$0]  %s232_s1, 256, %s40_s24, [#allocation6], %s176_s19, %s176_s19, %s177_s20  }
  0x23   :  { %169 = dma.done.wait [#allocation3], 256  }
  0x24   :  { %170 = vsyncadd [#allocation3], 4294967040 }
  0x25   :  { %171 = dma.done.wait [#allocation6], 256  }
  0x26   :  { %172 = vsyncadd [#allocation6], 4294967040  ;;  %v65_v0 = vld [vmem:[#allocation2] sm:$0xff]  ;;  %v66_v1 = vld [vmem:[#allocation2 + $0x8] sm:$0xff]  ;;  %s179_s6 = smov [#allocation7]  }
  0x27   :  { %v67_v2 = vld [vmem:[#allocation5] sm:$0xff]  ;;  %v68_v3 = vld [vmem:[#allocation5 + $0x8] sm:$0xff]  ;;  %s83_s7 = sshll.u32 %s179_s6, 4  ;;  %s84_s7 = int_to_ptr.vmem [resolvable:$true] %s83_s7 }
  0x28   :  { %v69_v4 = vsub.f32 %v65_v0, %v67_v2  ;;  %v70_v5 = vsub.f32 %v66_v1, %v68_v3  ;;  %s147_s8 = scalar_lea.vmem %s84_s7, 128  ;;  %p152_p3 = scmp.lt.s32.totalorder %s84_s7, %s84_s7 }
  0x29   :  { %p148_p2 = scmp.ne.s32.totalorder %s84_s7, %s147_s8  ;;  %p153_p4 = scmp.lt.s32.totalorder %s147_s8, %s147_s8 }
  0x2a   :  { %v71_v6 = vand.u32 2147483647, %v69_v4  ;;  %v72_v7 = vand.u32 2147483647, %v70_v5 }
  0x2b   :  { %p154_p5 = por %p153_p4, %p152_p3 }
  0x2c   :  { %v74_v8 = vadd.f32 %v72_v7, %v71_v6 }
  0x2d   :  { %p155_p6 = pnand %p154_p5, %p148_p2 }
  0x2e   :  { %76 = vst [vmem:[#allocation7] sm:$0xff] %v74_v8 }
  0x2f   :  { %158 = shalt.err (!%p155_p6)
}
  0x30   :  { %s159_s10 = scalar_lea.hbm %s233_s2, 128 }
  0x31   :  { %p160_p7 = scmp.ne.s32.totalorder %s233_s2, %s159_s10  ;;  %p163_p8 = scmp.lt.u32.totalorder %s159_s10, %s233_s2 }
  0x33   :  { %p165_p9 = pnand %p163_p8, %p160_p7 }
  0x35   :  { %168 = shalt.err (!%p165_p9)
}
  0x36   :  { %86 = dma.vmem_to_hbm [thread:$0]  %s84_s7, 128, %s233_s2, [#allocation4]  }
  0x37   :  { %173 = dma.done.wait [#allocation4], 128  }
  0x38   :  { %174 = vsyncadd [#allocation4], 4294967168 }
  0x39   :  { %90 = vsyncpa [#allocation3], 1 }
  0x3a   :  { %91 = vsyncpa [#allocation6], 1 }
  0x3b   :  { %92 = vsyncpa [#allocation4], 1 }

</bundles_post_ra>
